<compile_context>
chip_gen: v5e
topology: v5e:2x2
jax: 0.10.0
libtpu: 0.0.40
codegen_flags: <defaults>
</compile_context>

<pallas_src>
import numpy as np
import jax
import jax.numpy as jnp
from jax import lax
from jax.experimental import pallas as pl
from jax.experimental.pallas import tpu as pltpu

HID = 300        # logical hidden size of pfn_unit / Pre_Predictions / Pair_Construct
HID_PAD = 384    # lane-padded gate width (3 * 128)


# ----------------------------------------------------------------------------
# Kernel 1: RGCN_Network  (RGCNConv over the fully-connected relative-position
# graph; relation r(src->tgt) = min(|tgt+1-src|, K), mean aggregation per
# relation, num_bases=2 basis decomposition, root + bias).
# Batch folded into rows; basis algebra exploited: 5 matmuls total.
# ----------------------------------------------------------------------------
def _rgcn_kernel(x_ref, ablk_ref, basis_ref, wroot_ref, bias_ref, o_ref):
    f32, bf16 = jnp.float32, jnp.bfloat16
    xb = x_ref[...]                                            # [B*S, D] bf16
    acc = jnp.dot(xb, wroot_ref[...],
                  preferred_element_type=f32) + bias_ref[...]
    for b in range(basis_ref.shape[0]):                        # 2 bases, static
        xw = jnp.dot(xb, basis_ref[b], preferred_element_type=f32)
        acc = acc + jnp.dot(ablk_ref[b], xw.astype(bf16),
                            preferred_element_type=f32)
    o_ref[...] = acc.astype(o_ref.dtype)


def rgcn_network(x_bsd, p, K):
    B, S, D = x_bsd.shape
    R = K + 1
    # per-relation normalized adjacency A_r[tgt, src] (mean aggregation), static
    src = np.arange(S).reshape(-1, 1)
    tgt = np.arange(S).reshape(1, -1)
    rel = np.minimum(np.abs(tgt + 1 - src), K)                 # rel[src, tgt]
    a_r = np.zeros((R, S, S), np.float32)
    for r in range(R):
        m = (rel == r).astype(np.float32)
        deg = m.sum(axis=0)                                    # in-degree of each target
        a_r[r] = (m / np.maximum(deg, 1.0)).T                  # [tgt, src]
    # num_bases=2 algebra: sum_r A_r X W_r = sum_b (sum_r comp[r,b] A_r) X basis_b
    a_tilde = jnp.einsum('rb,rts->bts', p["rgcn_comp"], jnp.asarray(a_r))   # [2,S,S]
    # fold batch into rows: block-diagonal adjacency over the B*S row space
    eye_b = jnp.eye(B, dtype=a_tilde.dtype)
    a_blk = jnp.einsum('pq,bts->bptqs', eye_b, a_tilde).reshape(2, B * S, B * S)
    a_blk = a_blk.astype(jnp.bfloat16)

    basis = p["rgcn_basis"].astype(jnp.bfloat16)               # [2, D, D]
    root = p["rgcn_root"].astype(jnp.bfloat16)
    x2 = x_bsd.reshape(B * S, D).astype(jnp.bfloat16)

    # TODO(synk): at production D/K sizes, size vmem_limit_bytes to residency;
    # on v7x a grid=(B,) "parallel" variant would shard over the megacore.
    out = pl.pallas_call(
        _rgcn_kernel,
        out_shape=jax.ShapeDtypeStruct((B * S, D), jnp.bfloat16),
    )(x2, a_blk, basis, root, p["rgcn_bias"])
    return out.reshape(B, S, D)


# ----------------------------------------------------------------------------
# Kernel 2: fused Partition_Encoder (PFN recurrence) + Pre_Predictions +
# Pair_Construct.  Single grid-less pallas_call, everything VMEM-resident.
# ----------------------------------------------------------------------------
def _pad_cols_grouped(w, h, hp, groups):
    """Zero-pad each of `groups` column blocks of width h to width hp."""
    parts = [jnp.pad(w[..., g * h:(g + 1) * h],
                     [(0, 0)] * (w.ndim - 1) + [(0, hp - h)]) for g in range(groups)]
    return jnp.concatenate(parts, axis=-1)


def _pad_rows_grouped(w, h, hp, groups):
    """Zero-pad each of `groups` row blocks of height h to height hp."""
    parts = [jnp.pad(w[g * h:(g + 1) * h],
                     [(0, hp - h)] + [(0, 0)] * (w.ndim - 1)) for g in range(groups)]
    return jnp.concatenate(parts, axis=0)


def _make_head_kernel(S, Bp, H, Hp):
    f32, bf16 = jnp.float32, jnp.bfloat16

    def kernel(x_ref,
               wi_ref, bi_ref, wh_ref, bh_ref, wt_ref, bt_ref, tri_ref,
               wecat_ref, be_ref, woe_ref, boe_ref,
               wccat_ref, bc_ref, woc_ref, boc_ref,
               w1e_ref, w1c_ref, kp_ref, lng_ref, lnb_ref, w2_ref, b2_ref,
               sele_ref, selc_ref,
               cpl_ref, pe_ref, pc_ref,
               gin_sc, hemo_sc, hcau_sc, hshare_sc):

        # ---- hoisted, time-invariant input-gate matmul: [S*Bp, D] @ [D, 5Hp]
        gin_sc[...] = (jnp.dot(x_ref[...], wi_ref[...],
                               preferred_element_type=f32) + bi_ref[...])

        # ---- PFN recurrence ------------------------------------------------
        def step(t, carry):
            h_prev, c_prev = carry                             # [Bp, Hp] f32
            r0 = pl.multiple_of(t * Bp, 8)
            g = (gin_sc[pl.ds(r0, Bp), :]
                 + jnp.dot(h_prev.astype(bf16), wh_ref[...],
                           preferred_element_type=f32) + bh_ref[...])   # [Bp, 5Hp]

            c_hat = jnp.tanh(g[:, 0:Hp])

            # fused cumulative softmax of the 4 ordering gates: one stacked
            # softmax + ONE triangular matmul instead of four.
            gs = jnp.concatenate([g[:, Hp:2 * Hp], g[:, 2 * Hp:3 * Hp],
                                  g[:, 3 * Hp:4 * Hp], g[:, 4 * Hp:5 * Hp]],
                                 axis=0)                       # [4*Bp, Hp]
            m = jnp.max(gs, axis=-1, keepdims=True)
            e = jnp.exp(gs - m)                                # pad lanes -> exp(-1e30)=0
            sm = e / jnp.sum(e, axis=-1, keepdims=True)
            # cumsum along lanes via upper-triangular matmul
            # TODO(synk): bf16 operands trade ~1e-3 rel. accuracy vs f32 cumsum.
            cs = jnp.dot(sm.astype(bf16), tri_ref[...],
                         preferred_element_type=f32)           # [4*Bp, Hp]
            eg_cin = 1.0 - cs[0 * Bp:1 * Bp]
            rg_cin = cs[1 * Bp:2 * Bp]
            eg_c = 1.0 - cs[2 * Bp:3 * Bp]
            rg_c = cs[3 * Bp:4 * Bp]

            overlap_c = rg_c * eg_c
            upper_c = rg_c - overlap_c
            downer_c = eg_c - overlap_c
            overlap_cin = rg_cin * eg_cin
            upper_cin = rg_cin - overlap_cin
            downer_cin = eg_cin - overlap_cin

            share = overlap_cin * c_prev + overlap_c * c_hat
            c_cau = upper_cin * c_prev + upper_c * c_hat
            c_emo = downer_cin * c_prev + downer_c * c_hat

            # fused cell transform: [Bp, 3Hp] @ [3Hp, Hp]  (lane-aligned concat)
            cat = jnp.concatenate([c_cau, c_emo, share], axis=-1).astype(bf16)
            c_new = jnp.dot(cat, wt_ref[...],
                            preferred_element_type=f32) + bt_ref[...]
            h_new = jnp.tanh(c_new)

            # full-tile, 8-aligned stores into flat [S*Bp, Hp] scratch
            hemo_sc[pl.ds(r0, Bp), :] = jnp.tanh(c_emo)
            hcau_sc[pl.ds(r0, Bp), :] = jnp.tanh(c_cau)
            hshare_sc[pl.ds(r0, Bp), :] = jnp.tanh(share)
            return (h_new, c_new)

        zeros = jnp.zeros((Bp, Hp), f32)
        lax.fori_loop(0, S, step, (zeros, zeros),
                      unroll=(True if S <= 8 else 4))

        # ---- batched head over all S*Bp clause rows (no per-batch loop) ----
        he = hemo_sc[...]
        hc = hcau_sc[...]
        hs = hshare_sc[...]

        def leaky(v):
            return jnp.where(v > 0, v, 0.01 * v)

        def row_dot(w_row, mat):                                # [1,Hp]x[N,Hp]->[1,N]
            return lax.dot_general(w_row, mat, (((1,), (1,)), ((), ())),
                                   preferred_element_type=f32)

        # Pre_Predictions (emotion / cause), lane-dense [1, S*Bp] output rows
        cat_e = jnp.concatenate([he, hs], axis=-1).astype(bf16)
        se = leaky(jnp.dot(cat_e, wecat_ref[...],
                           preferred_element_type=f32) + be_ref[...])
        pe_ref[...] = row_dot(woe_ref[...], se.astype(bf16)) + boe_ref[...]

        cat_c = jnp.concatenate([hc, hs], axis=-1).astype(bf16)
        sc = leaky(jnp.dot(cat_c, wccat_ref[...],
                           preferred_element_type=f32) + bc_ref[...])
        pc_ref[...] = row_dot(woc_ref[...], sc.astype(bf16)) + boc_ref[...]

        # Pair_Construct: project clauses first, expand to pairs via one-hot
        # [B*Np, S*Bp] matmuls; batch-invariant position term (kp_ref) hoisted.
        ep = jnp.dot((he + hs).astype(bf16), w1e_ref[...],
                     preferred_element_type=f32)                # [S*Bp, Hp]
        cp = jnp.dot((hc + hs).astype(bf16), w1c_ref[...],
                     preferred_element_type=f32)
        h1 = (jnp.dot(sele_ref[...], ep.astype(bf16), preferred_element_type=f32)
              + jnp.dot(selc_ref[...], cp.astype(bf16), preferred_element_type=f32)
              + kp_ref[...])                                    # [B*Np, Hp]

        # LayerNorm over the H valid lanes (pad lanes of h1 are exactly zero)
        lane = lax.broadcasted_iota(jnp.int32, (1, Hp), 1)
        lmask = (lane < H).astype(f32)
        mu = jnp.sum(h1, axis=-1, keepdims=True) * (1.0 / H)
        cen = (h1 - mu) * lmask
        var = jnp.sum(cen * cen, axis=-1, keepdims=True) * (1.0 / H)
        hn = cen * lax.rsqrt(var + 1e-5) * lng_ref[...] + lnb_ref[...]
        act = jnp.where(hn > 0, hn, jnp.exp(hn) - 1.0)          # ELU; eval dropout = id
        cpl_ref[...] = row_dot(w2_ref[...], act.astype(bf16)) + b2_ref[...]

    return kernel


def pfn_pred_pair(doc_sents_h, p, K):
    B, S, D = doc_sents_h.shape
    H, Hp = HID, HID_PAD
    Bp = ((B + 7) // 8) * 8            # pad batch to full (8,128) sublane tiles
    f32, bf16 = jnp.float32, jnp.bfloat16

    # ---- static couple bookkeeping (index glue, identical to reference) ----
    base_idx = np.arange(1, S + 1)
    emo_pos = np.concatenate([base_idx.reshape(-1, 1)] * S, axis=1).reshape(-1)
    cau_pos = np.concatenate([base_idx] * S, axis=0)
    rel_pos = cau_pos - emo_pos
    if S > K + 1:
        keep = np.abs(rel_pos) <= K
        rel_pos, emo_pos, cau_pos = rel_pos[keep], emo_pos[keep], cau_pos[keep]
    Np = rel_pos.shape[0]
    emo_cau_pos = [[int(e), int(c)] for e, c in zip(emo_pos, cau_pos)]

    # batch-invariant position term, hoisted: (kernel @ rel_pos_emb) @ W_p + b1
    rel_shift = rel_pos + K
    rel_pos_emb = p["pos_emb"][jnp.asarray(rel_shift, jnp.int32)]     # [Np, pos_dim]
    diff = rel_shift.reshape(-1, 1).astype(np.float32) - rel_shift.reshape(1, -1)
    ker = jnp.asarray(np.exp(-diff ** 2), f32)                         # [Np, Np]
    kp = (ker @ rel_pos_emb) @ p["w1p"] + p["b1"]                      # [Np, H]
    kp = jnp.pad(kp, ((0, 0), (0, Hp - H)))
    kp_tiled = jnp.tile(kp, (B, 1))                                    # rows b*Np + j

    # one-hot pair-expansion matrices over the (t, b)-flattened clause rows
    q = np.arange(B * Np)
    bq, jq = q // Np, q % Np
    sel_e = np.zeros((B * Np, S * Bp), np.float32)
    sel_e[q, (emo_pos[jq] - 1) * Bp + bq] = 1.0
    sel_c = np.zeros((B * Np, S * Bp), np.float32)
    sel_c[q, (cau_pos[jq] - 1) * Bp + bq] = 1.0

    # ---- lane-padded weight layouts (every gate block padded H -> Hp) ------
    NEG = -1e30
    wi = _pad_cols_grouped(p["pfn_wi"], H, Hp, 5).astype(bf16)          # [D, 5Hp]
    wh = jnp.pad(_pad_cols_grouped(p["pfn_wh"], H, Hp, 5),
                 ((0, Hp - H), (0, 0))).astype(bf16)                    # [Hp, 5Hp]
    # input-gate bias pad lanes: 0 for the tanh gate, -1e30 for the 4 softmax
    # gates (so pad lanes vanish from the softmax sums).
    bi_parts = []
    for gidx in range(5):
        pad_val = 0.0 if gidx == 0 else NEG
        bi_parts.append(jnp.pad(p["pfn_bi"][:, gidx * H:(gidx + 1) * H],
                                ((0, 0), (0, Hp - H)), constant_values=pad_val))
    bi = jnp.concatenate(bi_parts, axis=-1)                             # [1, 5Hp] f32
    bh = _pad_cols_grouped(p["pfn_bh"], H, Hp, 5)                       # [1, 5Hp] f32
    wt = jnp.pad(_pad_rows_grouped(p["pfn_wt"], H, Hp, 3),
                 ((0, 0), (0, Hp - H))).astype(bf16)                    # [3Hp, Hp]
    bt = jnp.pad(p["pfn_bt"], ((0, 0), (0, Hp - H)))
    tri = jnp.triu(jnp.ones((Hp, Hp), f32)).astype(bf16)                # lane cumsum

    we_cat = jnp.pad(_pad_rows_grouped(p["we_cat"], H, Hp, 2),
                     ((0, 0), (0, Hp - H))).astype(bf16)                # [2Hp, Hp]
    wc_cat = jnp.pad(_pad_rows_grouped(p["wc_cat"], H, Hp, 2),
                     ((0, 0), (0, Hp - H))).astype(bf16)
    be = jnp.pad(p["be"], ((0, 0), (0, Hp - H)))
    bc = jnp.pad(p["bc"], ((0, 0), (0, Hp - H)))
    woe = jnp.pad(p["woe"], ((0, 0), (0, Hp - H))).astype(bf16)
    woc = jnp.pad(p["woc"], ((0, 0), (0, Hp - H))).astype(bf16)
    w1e = jnp.pad(p["w1e"], ((0, Hp - H), (0, Hp - H))).astype(bf16)
    w1c = jnp.pad(p["w1c"], ((0, Hp - H), (0, Hp - H))).astype(bf16)
    ln_g = jnp.pad(p["ln_g"], ((0, 0), (0, Hp - H)))
    ln_b = jnp.pad(p["ln_b"], ((0, 0), (0, Hp - H)))
    w2 = jnp.pad(p["w2"], ((0, 0), (0, Hp - H))).astype(bf16)

    # x: flat [S*Bp, D] with row = t*Bp + b (padded batch rows are zero)
    x_sbd = jnp.transpose(doc_sents_h, (1, 0, 2))
    x_sbd = jnp.pad(x_sbd.astype(f32), ((0, 0), (0, Bp - B), (0, 0)))
    x = x_sbd.reshape(S * Bp, D).astype(bf16)

    kernel = _make_head_kernel(S=S, Bp=Bp, H=H, Hp=Hp)

    # TODO(synk): on v7x, shard this call over the megacore with a grid=(B,)
    # "parallel" axis; kept grid-less here to preserve the larger batched
    # matmuls on v5e/v6e (single TensorCore).
    couples_row, pe_row, pc_row = pl.pallas_call(
        kernel,
        out_shape=(jax.ShapeDtypeStruct((1, B * Np), f32),
                   jax.ShapeDtypeStruct((1, S * Bp), f32),
                   jax.ShapeDtypeStruct((1, S * Bp), f32)),
        scratch_shapes=[pltpu.VMEM((S * Bp, 5 * Hp), f32),
                        pltpu.VMEM((S * Bp, Hp), f32),
                        pltpu.VMEM((S * Bp, Hp), f32),
                        pltpu.VMEM((S * Bp, Hp), f32)],
    )(x, wi, bi, wh, bh, wt, bt, tri,
      we_cat, be, woe, p["boe"], wc_cat, bc, woc, p["boc"],
      w1e, w1c, kp_tiled, ln_g, ln_b, w2, p["b2"],
      jnp.asarray(sel_e, bf16), jnp.asarray(sel_c, bf16))

    couples = couples_row.reshape(B, Np)
    pred_e = pe_row.reshape(S, Bp)[:, :B].T                             # [B, S]
    pred_c = pc_row.reshape(S, Bp)[:, :B].T
    return couples, emo_cau_pos, pred_e, pred_c


# ----------------------------------------------------------------------------
# Parameters (deterministic, synthetic; logical shapes, f32) and full forward
# ----------------------------------------------------------------------------
def init_params(key, vocab, glm_hidden, pos_dim, K, dropout_hidden):
    ks = jax.random.split(key, 32)
    f32 = jnp.float32
    H = HID

    def n(k, shape, fan):
        return jax.random.normal(k, shape, f32) / np.sqrt(float(fan))

    p = {}
    p["glm_emb"] = n(ks[0], (vocab, glm_hidden), glm_hidden)

    # RGCN_Network: RGCNConv(glm_hidden, glm_hidden, K+1 relations, num_bases=2)
    p["rgcn_basis"] = n(ks[1], (2, glm_hidden, glm_hidden), glm_hidden)
    p["rgcn_comp"] = n(ks[2], (K + 1, 2), 2)
    p["rgcn_root"] = n(ks[3], (glm_hidden, glm_hidden), glm_hidden)
    p["rgcn_bias"] = n(ks[4], (1, glm_hidden), glm_hidden)

    # pfn_unit: 5 input / 5 hidden gates fused along the output dim
    p["pfn_wi"] = n(ks[5], (glm_hidden, 5 * H), glm_hidden)
    p["pfn_bi"] = n(ks[6], (1, 5 * H), H)
    # LinearDropConnect in eval mode: weight * (1 - dropout)
    p["pfn_wh"] = n(ks[7], (H, 5 * H), H) * (1.0 - dropout_hidden)
    p["pfn_bh"] = n(ks[8], (1, 5 * H), H)
    # 3 cell transforms fused on the contraction dim: rows [W_cau; W_emo; W_share]
    p["pfn_wt"] = n(ks[9], (3 * H, H), 3 * H)
    p["pfn_bt"] = n(ks[10], (1, H), H)

    # Pre_Predictions (concat([h, h_share]) -> H -> 1), weights pre-stacked
    p["we_cat"] = n(ks[11], (2 * H, H), 2 * H)
    p["be"] = n(ks[12], (1, H), H)
    p["woe"] = n(ks[13], (1, H), H)
    p["boe"] = n(ks[14], (1, 1), 1)
    p["wc_cat"] = n(ks[15], (2 * H, H), 2 * H)
    p["bc"] = n(ks[16], (1, H), H)
    p["woc"] = n(ks[17], (1, H), H)
    p["boc"] = n(ks[18], (1, 1), 1)

    # Pair_Construct
    p["pos_emb"] = n(ks[19], (2 * K + 1, pos_dim), pos_dim)
    p["w1e"] = n(ks[20], (H, H), 2 * H + pos_dim)
    p["w1c"] = n(ks[21], (H, H), 2 * H + pos_dim)
    p["w1p"] = n(ks[22], (pos_dim, H), 2 * H + pos_dim)     # folded in wrapper
    p["b1"] = n(ks[23], (1, H), H)
    p["ln_g"] = jnp.ones((1, H), f32)
    p["ln_b"] = jnp.zeros((1, H), f32)
    p["w2"] = n(ks[24], (1, H), H)
    p["b2"] = n(ks[25], (1, 1), 1)
    return p


def llm_mtln_forward(params, glm_token_b, glm_clause_b, K, use_rgcn=True):
    # TODO(synk): the pretrained 'glm-large-chinese' backbone has no Pallas
    # equivalent; its contextual hidden states are replaced by a deterministic
    # embedding lookup of the token ids.
    hidden_state = params["glm_emb"][glm_token_b]                      # [B, L, D]

    # batched_index_select (gather clause-end hidden states)
    B, L, D = hidden_state.shape
    S = glm_clause_b.shape[1]
    idx = jnp.broadcast_to(glm_clause_b[:, :, None], (B, S, D))
    doc_sents_h = jnp.take_along_axis(hidden_state, idx, axis=1)       # [B, S, D]

    if use_rgcn:
        doc_sents_h = rgcn_network(doc_sents_h, params, K)             # RGCN_Network

    couples_pred, emo_cau_pos, pred_e, pred_c = pfn_pred_pair(doc_sents_h, params, K)
    return couples_pred, emo_cau_pos, pred_e, pred_c


if __name__ == "__main__":
    B, S, L_TOK = 2, 8, 24
    GLM_HIDDEN, POS_DIM, K = 32, 16, 3
    VOCAB = 64
    DROPOUT_HIDDEN = 0.1

    key = jax.random.PRNGKey(0)
    k_par, k_tok, k_cls = jax.random.split(key, 3)
    params = init_params(k_par, VOCAB, GLM_HIDDEN, POS_DIM, K, DROPOUT_HIDDEN)

    glm_token_b = jax.random.randint(k_tok, (B, L_TOK), 0, VOCAB, dtype=jnp.int32)
    glm_clause_b = jax.random.randint(k_cls, (B, S), 0, L_TOK, dtype=jnp.int32)

    couples_pred, emo_cau_pos, pred_e, pred_c = llm_mtln_forward(
        params, glm_token_b, glm_clause_b, K)

    jax.block_until_ready((couples_pred, pred_e, pred_c))
    assert couples_pred.shape == (B, len(emo_cau_pos))
    assert pred_e.shape == (B, S) and pred_c.shape == (B, S)
    assert bool(jnp.all(jnp.isfinite(couples_pred)))
    assert bool(jnp.all(jnp.isfinite(pred_e))) and bool(jnp.all(jnp.isfinite(pred_c)))
    print("KERNEL_OK")
</pallas_src>

<mosaic_0001>
module attributes {stable_mosaic.version = 11 : i64} {
  func.func @_rgcn_kernel(%arg0: memref<16x32xbf16, #tpu.memory_space<vmem>>, %arg1: memref<2x16x16xbf16, #tpu.memory_space<vmem>>, %arg2: memref<2x32x32xbf16, #tpu.memory_space<vmem>>, %arg3: memref<32x32xbf16, #tpu.memory_space<vmem>>, %arg4: memref<1x32xf32, #tpu.memory_space<vmem>>, %arg5: memref<16x32xbf16, #tpu.memory_space<vmem>>) attributes {dimension_semantics = [], scalar_prefetch = 0 : i64, scratch_operands = 0 : i64, tpu.core_type = #tpu.core_type<tc>} {
    %c0 = arith.constant 0 : index
    %c0_0 = arith.constant 0 : index
    %0 = vector.load %arg0[%c0, %c0_0] : memref<16x32xbf16, #tpu.memory_space<vmem>>, vector<16x32xbf16>
    %c0_1 = arith.constant 0 : index
    %c0_2 = arith.constant 0 : index
    %1 = vector.load %arg3[%c0_1, %c0_2] : memref<32x32xbf16, #tpu.memory_space<vmem>>, vector<32x32xbf16>
    %cst = arith.constant dense<0.000000e+00> : vector<16x32xf32>
    %2 = tpu.matmul %0, %1, %cst {dimension_numbers = #tpu.dot_dimension_numbers<[1], [0], [0], [1], [0, 0, 1, 1], [], []>} : vector<16x32xbf16>, vector<32x32xbf16>, vector<16x32xf32> -> vector<16x32xf32>
    %c0_3 = arith.constant 0 : index
    %c0_4 = arith.constant 0 : index
    %3 = vector.load %arg4[%c0_3, %c0_4] : memref<1x32xf32, #tpu.memory_space<vmem>>, vector<1x32xf32>
    %4 = vector.broadcast %3 : vector<1x32xf32> to vector<16x32xf32>
    %5 = arith.addf %2, %4 : vector<16x32xf32>
    %c0_5 = arith.constant 0 : index
    %c0_6 = arith.constant 0 : index
    %c0_7 = arith.constant 0 : index
    %6 = vector.load %arg2[%c0_5, %c0_6, %c0_7] : memref<2x32x32xbf16, #tpu.memory_space<vmem>>, vector<1x32x32xbf16>
    %7 = vector.shape_cast %6 : vector<1x32x32xbf16> to vector<32x32xbf16>
    %cst_8 = arith.constant dense<0.000000e+00> : vector<16x32xf32>
    %8 = tpu.matmul %0, %7, %cst_8 {dimension_numbers = #tpu.dot_dimension_numbers<[1], [0], [0], [1], [0, 0, 1, 1], [], []>} : vector<16x32xbf16>, vector<32x32xbf16>, vector<16x32xf32> -> vector<16x32xf32>
    %c0_9 = arith.constant 0 : index
    %c0_10 = arith.constant 0 : index
    %c0_11 = arith.constant 0 : index
    %9 = vector.load %arg1[%c0_9, %c0_10, %c0_11] : memref<2x16x16xbf16, #tpu.memory_space<vmem>>, vector<1x16x16xbf16>
    %10 = vector.shape_cast %9 : vector<1x16x16xbf16> to vector<16x16xbf16>
    %11 = arith.truncf %8 : vector<16x32xf32> to vector<16x32xbf16>
    %cst_12 = arith.constant dense<0.000000e+00> : vector<16x32xf32>
    %12 = tpu.matmul %10, %11, %cst_12 {dimension_numbers = #tpu.dot_dimension_numbers<[1], [0], [0], [1], [0, 0, 1, 1], [], []>} : vector<16x16xbf16>, vector<16x32xbf16>, vector<16x32xf32> -> vector<16x32xf32>
    %13 = arith.addf %5, %12 : vector<16x32xf32>
    %c1 = arith.constant 1 : index
    %c0_13 = arith.constant 0 : index
    %c0_14 = arith.constant 0 : index
    %14 = vector.load %arg2[%c1, %c0_13, %c0_14] : memref<2x32x32xbf16, #tpu.memory_space<vmem>>, vector<1x32x32xbf16>
    %15 = vector.shape_cast %14 : vector<1x32x32xbf16> to vector<32x32xbf16>
    %cst_15 = arith.constant dense<0.000000e+00> : vector<16x32xf32>
    %16 = tpu.matmul %0, %15, %cst_15 {dimension_numbers = #tpu.dot_dimension_numbers<[1], [0], [0], [1], [0, 0, 1, 1], [], []>} : vector<16x32xbf16>, vector<32x32xbf16>, vector<16x32xf32> -> vector<16x32xf32>
    %c1_16 = arith.constant 1 : index
    %c0_17 = arith.constant 0 : index
    %c0_18 = arith.constant 0 : index
    %17 = vector.load %arg1[%c1_16, %c0_17, %c0_18] : memref<2x16x16xbf16, #tpu.memory_space<vmem>>, vector<1x16x16xbf16>
    %18 = vector.shape_cast %17 : vector<1x16x16xbf16> to vector<16x16xbf16>
    %19 = arith.truncf %16 : vector<16x32xf32> to vector<16x32xbf16>
    %cst_19 = arith.constant dense<0.000000e+00> : vector<16x32xf32>
    %20 = tpu.matmul %18, %19, %cst_19 {dimension_numbers = #tpu.dot_dimension_numbers<[1], [0], [0], [1], [0, 0, 1, 1], [], []>} : vector<16x16xbf16>, vector<16x32xbf16>, vector<16x32xf32> -> vector<16x32xf32>
    %21 = arith.addf %13, %20 : vector<16x32xf32>
    %22 = arith.truncf %21 : vector<16x32xf32> to vector<16x32xbf16>
    %c0_20 = arith.constant 0 : index
    %c0_21 = arith.constant 0 : index
    %23 = vector.load %arg5[%c0_20, %c0_21] : memref<16x32xbf16, #tpu.memory_space<vmem>>, vector<16x32xbf16>
    tpu.vector_store %arg5[%c0_20, %c0_21], %22 {strides = array<i32>} : memref<16x32xbf16, #tpu.memory_space<vmem>>, vector<16x32xbf16>,
    return
  }
}

</mosaic_0001>

<bundles_post_ra>
// kernel: tpu_custom_call.1
= control target key start
LH: loop header
LB: loop body
LE: loop exit
PB: predicated region body
PF: predicated region fallthrough
CT: control target
= control target key end

     0   :  { %10 = vsyncpa [#allocation3], 0  ;;  %s529_s0 = inlined_call_operand.hbm [shape: bf16[16,32], index: 0, kind: input, shape index: {}]   ;;  %s530_s1 = inlined_call_operand.hbm [shape: bf16[2,16,16], index: 1, kind: input, shape index: {}]   ;;  %s531_s2 = inlined_call_operand.hbm [shape: bf16[2,32,32], index: 2, kind: input, shape index: {}]   ;;  %s532_s3 = inlined_call_operand.hbm [shape: bf16[32,32], index: 3, kind: input, shape index: {}]   ;;  %s533_s4 = inlined_call_operand.vmem [shape: f32[1,32], index: 4, kind: input, shape index: {}]   ;;  %s534_s5 = inlined_call_operand.hbm [shape: bf16[16,32], index: 5, kind: output, shape index: {}]  }
   0x1   :  { %11 = vsyncpa [#allocation6], 0 }
   0x2   :  { %12 = vsyncpa [#allocation9], 0 }
   0x3   :  { %13 = vsyncpa [#allocation4], 0  ;;  %s31_s20 = sshll.u32 %s530_s1, 4  ;;  %s459_s21 = smov [#allocation5]   ;;  %s32_s20 = int_to_ptr.hbm [resolvable:$true] %s31_s20 }
   0x4   :  { %s33_s22 = sshll.u32 %s459_s21, 4  ;;  %s18_s25 = sshll.u32 %s529_s0, 4  ;;  %s34_s22 = int_to_ptr.vmem [resolvable:$true] %s33_s22  ;;  %s19_s25 = int_to_ptr.hbm [resolvable:$true] %s18_s25 }
   0x5   :  { %s460_s26 = smov 64   ;;  %s461_s27 = smov 4  }
   0x6   :  { %39 = dma.hbm_to_vmem [thread:$0]  %s32_s20, 256, %s34_s22, [#allocation6], %s460_s26, %s460_s26, %s461_s27  }
   0x7   :  { %s462_s28 = smov [#allocation2]   ;;  %s44_s1 = sshll.u32 %s531_s2, 4  ;;  %s45_s1 = int_to_ptr.hbm [resolvable:$true] %s44_s1 }
   0x8   :  { %s20_s29 = sshll.u32 %s462_s28, 4  ;;  %s57_s8 = sshll.u32 %s532_s3, 4  ;;  %s21_s29 = int_to_ptr.vmem [resolvable:$true] %s20_s29  ;;  %s58_s8 = int_to_ptr.hbm [resolvable:$true] %s57_s8 }
   0x9   :  { %26 = dma.hbm_to_vmem [thread:$0]  %s19_s25, 128, %s21_s29, [#allocation3], %s460_s26, %s460_s26, %s461_s27  }
   0xa   :  { %s463_s9 = smov [#allocation7]   ;;  %s464_s11 = smov [#allocation8]  }
   0xb   :  { %s46_s10 = sshll.u32 %s463_s9, 4  ;;  %s59_s2 = sshll.u32 %s464_s11, 4  ;;  %s47_s10 = int_to_ptr.vmem [resolvable:$true] %s46_s10  ;;  %s60_s2 = int_to_ptr.vmem [resolvable:$true] %s59_s2 }
   0xc   :  { %52 = dma.hbm_to_vmem [thread:$0]  %s45_s1, 512, %s47_s10, [#allocation6], %s460_s26, %s460_s26, %s461_s27  }
   0xd   :  { %65 = dma.hbm_to_vmem [thread:$0]  %s58_s8, 256, %s60_s2, [#allocation9], %s460_s26, %s460_s26, %s461_s27  }
   0xe   :  { %451 = dma.done.wait [#allocation3], 128  }
   0xf   :  { %452 = vsyncadd [#allocation3], 4294967168 }
  0x10   :  { %453 = dma.done.wait [#allocation6], 768  }
  0x11   :  { %454 = vsyncadd [#allocation6], 4294966528 }
  0x12   :  { %455 = dma.done.wait [#allocation9], 256  }
  0x13   :  { %456 = vsyncadd [#allocation9], 4294967040  ;;  %v318_v0 = vld [vmem:[#allocation7 + $0x8] sm:$0xff]  ;;  %v321_v1 = vld [vmem:[#allocation7 + $0x18] sm:$0xff]  ;;  %vm112_vm0 = vcmask 261120   ;;  %vm168_vm1 = vcmask 130048  }
  0x14   :  { %152 = vmatpush.bf16.msra.mxu1 %v318_v0  ;;  %211 = vmatpush.bf16.msra.mxu3 %v321_v1  ;;  %v317_v2 = vld [vmem:[#allocation7] sm:$0xff]  ;;  %v320_v3 = vld [vmem:[#allocation7 + $0x10] sm:$0xff]  ;;  %v314_v4 = vld [vmem:[#allocation2] sm:$0xff]  ;;  %vm249_vm2 = vcmask 257024   ;;  %s465_s13 = smov [#allocation10]   ;;  %s258_s17 = sshll.u32 %s534_s5, 4  ;;  %s259_s17 = int_to_ptr.hbm [resolvable:$true] %s258_s17 }
  0x15   :  { %v316_v5 = vld [vmem:[#allocation8 + $0x8] sm:$0xff]  ;;  %v315_v6 = vld [vmem:[#allocation8] sm:$0xff]  ;;  %v319_v11 = vld [vmem:[#allocation5] sm:$0xff]  ;;  %s256_s14 = sshll.u32 %s465_s13, 4  ;;  %s257_s14 = int_to_ptr.vmem [resolvable:$true] %s256_s14 }
  0x16   :  { %122 = vmatpush.bf16.msra.mxu0 %v316_v5  ;;  %v322_v14 = vld [vmem:[#allocation5 + $0x8] sm:$0xff]  ;;  %v330_v17 = vld [vmem:[%s533_s4] ss:$0 sm:$0xff] }
  0x18   :  { %153 = vmatpush.bf16.msra.mxu1 %v317_v2  ;;  %212 = vmatpush.bf16.msra.mxu3 %v320_v3 }
  0x1a   :  { %123 = vmatpush.bf16.msra.mxu0 %v315_v6 }
  0x1b   :  { %294 = vmatmul.msk.bf16.vlgmr.msra.gmra.mxu1 %vm112_vm0, %v314_v4  ;;  %308 = vmatmul.msk.bf16.vlgmr.msra.gmra.mxu3 %vm112_vm0, %v314_v4 }
  0x1d   :  { %285 = vmatmul.msk.bf16.vlgmr.msra.gmra.mxu0 %vm112_vm0, %v314_v4 }
  0x98   :  { %v155_v7 = vpop.f32.mrf.mxu1 }
  0x9a   :  { %v125_v16 = vpop.f32.mrf.mxu0 }
  0x9b   :  { %v126_v19 = vadd.f32 %v330_v17, %v125_v16 }
  0x9e   :  { %v214_v8 = vpop.f32.mrf.mxu3 }
  0xa0   :  { %v157_v9 = vpop.f32.mrf.mxu1 }
  0xa1   :  { %v162_v10 = vpack.c.bf16 %v157_v9, %v155_v7 }
  0xa2   :  { %v127_v21 = vpop.f32.mrf.mxu0 }
  0xa3   :  { %179 = vmatpush.bf16.msra.mxu2 %v162_v10  ;;  %v128_v24 = vadd.f32 %v330_v17, %v127_v21 }
  0xa6   :  { %299 = vmatmul.msk.bf16.vlgmr.msra.gmra.mxu2 %vm168_vm1, %v319_v11  ;;  %v216_v12 = vpop.f32.mrf.mxu3 }
  0xa7   :  { %v222_v13 = vpack.c.bf16 %v216_v12, %v214_v8 }
  0xa9   :  { %238 = vmatpush.bf16.msrb.mxu2 %v222_v13 }
  0xb6   :  { %313 = vmatmul.msk.bf16.vlgmr.msrb.gmra.mxu2 %vm168_vm1, %v322_v14 }
 0x129   :  { %v181_v15 = vpop.f32.mrf.mxu2 }
 0x12a   :  { %v186_v20 = vadd.f32 %v181_v15, %v126_v19 }
 0x131   :  { %v183_v18 = vpop.f32.mrf.mxu2 }
 0x132   :  { %v187_v26 = vadd.f32 %v183_v18, %v128_v24 }
 0x139   :  { %v240_v22 = vpop.f32.mrf.mxu2 }
 0x13a   :  { %v245_v23 = vadd.f32 %v240_v22, %v186_v20 }
 0x13c   :  { %v247_v25 = vpack.c.bf16 %v245_v23, %v245_v23 }
 0x13e   :  { %250 = vst.msk [vmem:[#allocation10] sm:$0xf] %vm249_vm2, %v247_v25 }
 0x141   :  { %v242_v27 = vpop.f32.mrf.mxu2 }
 0x142   :  { %v246_v28 = vadd.f32 %v242_v27, %v187_v26 }
 0x144   :  { %v248_v29 = vpack.c.bf16 %v246_v28, %v246_v28 }
 0x146   :  { %251 = vst.msk [vmem:[#allocation10 + $0x4] sm:$0xf] %vm249_vm2, %v248_v29 }
 0x147   :  { %264 = dma.vmem_to_hbm [thread:$0]  %s257_s14, 128, %s259_s17, [#allocation4], %s460_s26, %s460_s26, %s461_s27  }
 0x148   :  { %457 = dma.done.wait [#allocation4], 128  }
 0x149   :  { %458 = vsyncadd [#allocation4], 4294967168 }
 0x14a   :  { %269 = vsyncpa [#allocation3], 1 }
 0x14b   :  { %270 = vsyncpa [#allocation6], 1 }
 0x14c   :  { %271 = vsyncpa [#allocation9], 1 }
 0x14d   :  { %272 = vsyncpa [#allocation4], 1 }

</bundles_post_ra>
